<compile_context>
chip_gen: v6e
topology: v6e:2x2x1
jax: 0.10.0
libtpu: 0.0.40
codegen_flags: <defaults>
</compile_context>

<pallas_src>
import functools
import math

import jax
import jax.numpy as jnp
from jax import lax
from jax.experimental import pallas as pl
from jax.experimental.pallas import tpu as pltpu


# ---------------------------------------------------------------------------
# Kernel 1: fused QKV projection + RoPE -> head-major bf16 q / k / v
# ---------------------------------------------------------------------------
def _proj_rope_kernel(x_ref, w_ref, cosq_ref, sinq_ref, cosk_ref, sink_ref,
                      q_out_ref, k_out_ref, v_out_ref, *,
                      num_heads, kv_heads, head_dim):
    HD = head_dim
    NHD = num_heads * HD
    KHD = kv_heads * HD

    x = x_ref[0].astype(jnp.bfloat16)                                   # (TS, H)
    # One big MXU call: [q | rotate_half(q) | k | rotate_half(k) | v].
    qkv = jnp.dot(x, w_ref[...], preferred_element_type=jnp.float32)    # (TS, 2NHD+3KHD)

    # RoPE tables are (TS, HD) bf16 in HBM; q tables already carry 1/sqrt(HD).
    cos_q = cosq_ref[...].astype(jnp.float32)
    sin_q = sinq_ref[...].astype(jnp.float32)
    cos_k = cosk_ref[...].astype(jnp.float32)
    sin_k = sink_ref[...].astype(jnp.float32)

    # Per-head lane slices happen ONCE per (batch, seq-tile) here; outputs are
    # head-major so the attention kernel only indexes heads on major axes.
    for h in range(num_heads):
        q_h = qkv[:, h * HD:(h + 1) * HD]
        q_r = qkv[:, NHD + h * HD:NHD + (h + 1) * HD]
        q_out_ref[0, h] = (q_h * cos_q + q_r * sin_q).astype(jnp.bfloat16)

    k0 = 2 * NHD
    for g in range(kv_heads):
        k_g = qkv[:, k0 + g * HD:k0 + (g + 1) * HD]
        k_r = qkv[:, k0 + KHD + g * HD:k0 + KHD + (g + 1) * HD]
        v_g = qkv[:, k0 + 2 * KHD + g * HD:k0 + 2 * KHD + (g + 1) * HD]
        k_out_ref[0, g] = (k_g * cos_k + k_r * sin_k).astype(jnp.bfloat16)
        v_out_ref[0, g] = v_g.astype(jnp.bfloat16)


# ---------------------------------------------------------------------------
# Kernel 2: flash-style GQA attention + fused output projection
# ---------------------------------------------------------------------------
def _flash_attn_kernel(q_ref, k_ref, v_ref, wo_ref, o_ref,
                       m_ref, l_ref, acc_ref, *,
                       num_heads, kv_heads, head_dim):
    # NOTE: kv must stay the innermost "arbitrary" grid axis -- m/l/acc scratch
    # carries online-softmax state across it.
    ki = pl.program_id(2)
    n_rep = num_heads // kv_heads
    HD = head_dim
    tq = q_ref.shape[2]
    R = n_rep * tq

    @pl.when(ki == 0)
    def _():
        m_ref[...] = jnp.full(m_ref.shape, -jnp.inf, jnp.float32)
        l_ref[...] = jnp.zeros(l_ref.shape, jnp.float32)
        acc_ref[...] = jnp.zeros(acc_ref.shape, jnp.float32)

    for g in range(kv_heads):                      # static unroll over kv groups
        # Stack the group's n_rep query heads along the sublane axis so the
        # shared K feeds ONE MXU sequence per group (no K/V replication, no
        # per-head lane slicing at non-128 offsets).
        q_g = q_ref[0, g * n_rep:(g + 1) * n_rep].reshape(R, HD)       # bf16
        k_g = k_ref[0, g]                                              # (TK, HD) bf16
        v_g = v_ref[0, g]                                              # (TK, HD) bf16

        s = lax.dot_general(q_g, k_g, (((1,), (1,)), ((), ())),
                            preferred_element_type=jnp.float32)        # (R, TK)

        m_prev = m_ref[g]                                              # (R, 1)
        m_new = jnp.maximum(m_prev, jnp.max(s, axis=-1, keepdims=True))
        alpha = jnp.exp(m_prev - m_new)                                # (R, 1)
        p = jnp.exp(s - m_new)                                         # (R, TK) f32
        l_ref[g] = alpha * l_ref[g] + jnp.sum(p, axis=-1, keepdims=True)
        m_ref[g] = m_new
        # Per-group in-place accumulator update (no Python lists / lane concat).
        acc_ref[g] = alpha * acc_ref[g] + jnp.dot(
            p.astype(jnp.bfloat16), v_g, preferred_element_type=jnp.float32)

    @pl.when(ki == pl.num_programs(2) - 1)
    def _():
        # Normalize per group, then accumulate the output projection head by
        # head: out = sum_h ctx_h @ Wo[h*HD:(h+1)*HD, :].
        h_out = o_ref.shape[-1]
        o_acc = jnp.zeros((tq, h_out), jnp.float32)
        for g in range(kv_heads):
            inv = pl.reciprocal(l_ref[g], approx=True)                 # (R, 1)
            ctx_g = (acc_ref[g] * inv).astype(jnp.bfloat16)            # (R, HD)
            for r in range(n_rep):
                h = g * n_rep + r
                ctx_h = ctx_g[r * tq:(r + 1) * tq]                     # (TQ, HD)
                o_acc = o_acc + jnp.dot(ctx_h, wo_ref[h * HD:(h + 1) * HD, :],
                                        preferred_element_type=jnp.float32)
        o_ref[0] = o_acc.astype(o_ref.dtype)


# ---------------------------------------------------------------------------
# Glue
# ---------------------------------------------------------------------------
def make_rope_tables(seq_len, head_dim, base=10000.0):
    freq = 1.0 / base ** (jnp.arange(0, head_dim, 2, dtype=jnp.float32) / head_dim)
    positions = jnp.arange(seq_len, dtype=jnp.float32)
    angles = jnp.einsum('i,j->ij', positions, freq)                      # (S, HD/2)
    cos = jnp.concatenate([jnp.cos(angles), jnp.cos(angles)], axis=-1)   # (S, HD)
    sin = jnp.concatenate([jnp.sin(angles), jnp.sin(angles)], axis=-1)   # (S, HD)
    return cos, sin


def _rot_half_cols(w_t, n_heads, hd):
    """Permute/negate output columns so that x @ w_rot == rotate_half(x @ w_t)."""
    w3 = w_t.reshape(w_t.shape[0], n_heads, hd)
    half = hd // 2
    w_rot = jnp.concatenate([-w3[..., half:], w3[..., :half]], axis=-1)
    return w_rot.reshape(w_t.shape)


def _pick_tile(n, cap):
    """Largest tile <= cap that divides n and keeps sublane (8) alignment."""
    if n <= cap:
        return n
    for t in range(cap, 7, -1):
        if n % t == 0 and t % 8 == 0:
            return t
    return n


def _vmem_limit_bytes(frac=0.75, default=48 * 1024 * 1024):
    # v5e/v6e have 128 MiB VMEM per TensorCore, v7x only 64 MiB; ask for a
    # fraction of whatever this chip actually has, leaving headroom for the
    # compiler's internal scratch / double buffers.
    try:
        return int(pltpu.get_tpu_info().vmem_capacity_bytes * frac)
    except Exception:  # pragma: no cover - conservative fallback
        return default


def gqa_forward(x, wq_t, wk_t, wv_t, wo_t, *, num_heads, kv_heads,
                rope_base=10000.0):
    """x: (B, S, H) f32.  w*_t: (in, out) pre-transposed linear weights (f32)."""
    B, S, H = x.shape
    assert num_heads % kv_heads == 0
    head_dim = H // num_heads
    assert head_dim % 2 == 0
    NHD = num_heads * head_dim
    KHD = kv_heads * head_dim
    n_rep = num_heads // kv_heads

    # RoPE tables stored once per position (S, HD) in bf16 (no per-head tiling
    # in HBM); q's tables also absorb the 1/sqrt(head_dim) attention scale.
    cos, sin = make_rope_tables(S, head_dim, rope_base)
    scale = 1.0 / math.sqrt(head_dim)
    cos_q = (cos * scale).astype(jnp.bfloat16)
    sin_q = (sin * scale).astype(jnp.bfloat16)
    cos_k = cos.astype(jnp.bfloat16)
    sin_k = sin.astype(jnp.bfloat16)

    # Fused projection weight: [Wq | Wq_rot | Wk | Wk_rot | Wv] (bf16 MXU).
    w_fused = jnp.concatenate(
        [wq_t, _rot_half_cols(wq_t, num_heads, head_dim),
         wk_t, _rot_half_cols(wk_t, kv_heads, head_dim),
         wv_t], axis=1).astype(jnp.bfloat16)
    wo_bf = wo_t.astype(jnp.bfloat16)

    vmem_limit = _vmem_limit_bytes()

    # ---- kernel 1: fused QKV projection + RoPE (head-major outputs) ----
    ts = _pick_tile(S, 512)
    proj_kernel = functools.partial(_proj_rope_kernel, num_heads=num_heads,
                                    kv_heads=kv_heads, head_dim=head_dim)
    q_all, k_all, v_all = pl.pallas_call(
        proj_kernel,
        out_shape=(jax.ShapeDtypeStruct((B, num_heads, S, head_dim), jnp.bfloat16),
                   jax.ShapeDtypeStruct((B, kv_heads, S, head_dim), jnp.bfloat16),
                   jax.ShapeDtypeStruct((B, kv_heads, S, head_dim), jnp.bfloat16)),
        grid_spec=pltpu.PrefetchScalarGridSpec(
            num_scalar_prefetch=0,
            grid=(B, S // ts),
            in_specs=[
                pl.BlockSpec((1, ts, H), lambda b, si: (b, si, 0)),
                pl.BlockSpec((H, 2 * NHD + 3 * KHD), lambda b, si: (0, 0)),
                pl.BlockSpec((ts, head_dim), lambda b, si: (si, 0)),
                pl.BlockSpec((ts, head_dim), lambda b, si: (si, 0)),
                pl.BlockSpec((ts, head_dim), lambda b, si: (si, 0)),
                pl.BlockSpec((ts, head_dim), lambda b, si: (si, 0)),
            ],
            out_specs=[
                pl.BlockSpec((1, num_heads, ts, head_dim), lambda b, si: (b, 0, si, 0)),
                pl.BlockSpec((1, kv_heads, ts, head_dim), lambda b, si: (b, 0, si, 0)),
                pl.BlockSpec((1, kv_heads, ts, head_dim), lambda b, si: (b, 0, si, 0)),
            ],
        ),
        compiler_params=pltpu.CompilerParams(
            dimension_semantics=("parallel", "parallel"),
            vmem_limit_bytes=vmem_limit),
    )(x, w_fused, cos_q, sin_q, cos_k, sin_k)

    # ---- kernel 2: flash GQA attention + fused output projection ----
    tq = _pick_tile(S, 256)
    tk = _pick_tile(S, 512)
    attn_kernel = functools.partial(_flash_attn_kernel, num_heads=num_heads,
                                    kv_heads=kv_heads, head_dim=head_dim)
    out = pl.pallas_call(
        attn_kernel,
        out_shape=jax.ShapeDtypeStruct((B, S, H), jnp.float32),
        grid_spec=pltpu.PrefetchScalarGridSpec(
            num_scalar_prefetch=0,
            grid=(B, S // tq, S // tk),
            in_specs=[
                pl.BlockSpec((1, num_heads, tq, head_dim),
                             lambda b, qi, ki: (b, 0, qi, 0)),
                pl.BlockSpec((1, kv_heads, tk, head_dim),
                             lambda b, qi, ki: (b, 0, ki, 0)),
                pl.BlockSpec((1, kv_heads, tk, head_dim),
                             lambda b, qi, ki: (b, 0, ki, 0)),
                pl.BlockSpec((NHD, H), lambda b, qi, ki: (0, 0)),
            ],
            out_specs=pl.BlockSpec((1, tq, H), lambda b, qi, ki: (b, qi, 0)),
            scratch_shapes=[
                pltpu.VMEM((kv_heads, n_rep * tq, 1), jnp.float32),         # running max
                pltpu.VMEM((kv_heads, n_rep * tq, 1), jnp.float32),         # running denom
                pltpu.VMEM((kv_heads, n_rep * tq, head_dim), jnp.float32),  # accumulator
            ],
        ),
        compiler_params=pltpu.CompilerParams(
            dimension_semantics=("parallel", "parallel", "arbitrary"),
            vmem_limit_bytes=vmem_limit),
    )(q_all, k_all, v_all, wo_bf)
    return out


# ---------------------------------------------------------------------------
# Reference + init (plain JAX)
# ---------------------------------------------------------------------------
def init_linear(key, in_features, out_features):
    # PyTorch nn.Linear default: U(-1/sqrt(in), 1/sqrt(in)); returned as (in, out).
    bound = 1.0 / math.sqrt(in_features)
    w = jax.random.uniform(key, (out_features, in_features),
                           dtype=jnp.float32, minval=-bound, maxval=bound)
    return w.T


def reference_forward(x, wq_t, wk_t, wv_t, wo_t, *, num_heads, kv_heads,
                      rope_base=10000.0):
    """Pure-JAX f32 mirror of the PyTorch forward (no mask, bidirectional)."""
    B, S, H = x.shape
    hd = H // num_heads
    n_rep = num_heads // kv_heads
    cos, sin = make_rope_tables(S, hd, rope_base)
    q = (x @ wq_t).reshape(B, S, num_heads, hd).transpose(0, 2, 1, 3)
    k = (x @ wk_t).reshape(B, S, kv_heads, hd).transpose(0, 2, 1, 3)
    v = (x @ wv_t).reshape(B, S, kv_heads, hd).transpose(0, 2, 1, 3)

    def rot_half(t):
        t1, t2 = t[..., :hd // 2], t[..., hd // 2:]
        return jnp.concatenate([-t2, t1], axis=-1)

    q = q * cos + rot_half(q) * sin
    k = k * cos + rot_half(k) * sin
    k = jnp.repeat(k, n_rep, axis=1)
    v = jnp.repeat(v, n_rep, axis=1)
    scores = jnp.einsum('bhqd,bhkd->bhqk', q, k) / math.sqrt(hd)
    w = jax.nn.softmax(scores, axis=-1)
    ctx = jnp.einsum('bhqk,bhkd->bhqd', w, v)
    ctx = ctx.transpose(0, 2, 1, 3).reshape(B, S, H)
    return ctx @ wo_t


if __name__ == "__main__":
    # Small config: hidden=128, num_heads=4, kv_heads=2 -> head_dim=32
    batch, seq_len, hidden = 2, 16, 128
    num_heads, kv_heads = 4, 2

    key = jax.random.PRNGKey(0)
    kx, kq, kk, kv, ko = jax.random.split(key, 5)

    x = jax.random.normal(kx, (batch, seq_len, hidden), dtype=jnp.float32)
    wq_t = init_linear(kq, hidden, num_heads * (hidden // num_heads))
    wk_t = init_linear(kk, hidden, kv_heads * (hidden // num_heads))
    wv_t = init_linear(kv, hidden, kv_heads * (hidden // num_heads))
    wo_t = init_linear(ko, hidden, hidden)

    out = gqa_forward(x, wq_t, wk_t, wv_t, wo_t,
                      num_heads=num_heads, kv_heads=kv_heads)
    out = jax.block_until_ready(out)

    ref = reference_forward(x, wq_t, wk_t, wv_t, wo_t,
                            num_heads=num_heads, kv_heads=kv_heads)
    assert out.shape == (batch, seq_len, hidden)
    # Kernel uses bf16 MXU operands / bf16 RoPE tables (f32 accumulation);
    # compare against the f32 reference with a correspondingly loose tolerance.
    assert jnp.allclose(out, ref, atol=3e-2, rtol=3e-2), \
        f"max err {jnp.max(jnp.abs(out - ref))}"

    print("KERNEL_OK")
</pallas_src>

<mosaic_0001>
module attributes {stable_mosaic.version = 11 : i64} {
  func.func @_proj_rope_kernel(%arg0: i32, %arg1: i32, %arg2: memref<1x16x128xf32, #tpu.memory_space<vmem>>, %arg3: memref<128x448xbf16, #tpu.memory_space<vmem>>, %arg4: memref<16x32xbf16, #tpu.memory_space<vmem>>, %arg5: memref<16x32xbf16, #tpu.memory_space<vmem>>, %arg6: memref<16x32xbf16, #tpu.memory_space<vmem>>, %arg7: memref<16x32xbf16, #tpu.memory_space<vmem>>, %arg8: memref<1x4x16x32xbf16, #tpu.memory_space<vmem>>, %arg9: memref<1x2x16x32xbf16, #tpu.memory_space<vmem>>, %arg10: memref<1x2x16x32xbf16, #tpu.memory_space<vmem>>) attributes {dimension_semantics = [#tpu.dimension_semantics<parallel>, #tpu.dimension_semantics<parallel>], iteration_bounds = array<i64: 2, 1>, scalar_prefetch = 0 : i64, scratch_operands = 0 : i64, tpu.core_type = #tpu.core_type<tc>, window_params = [{transform_indices = @transform_0, window_bounds = array<i64: 1, 16, 128>}, {pipeline_mode = #tpu.pipeline_mode<synchronous>, transform_indices = @transform_1, window_bounds = array<i64: 128, 448>}, {transform_indices = @transform_2, window_bounds = array<i64: 16, 32>}, {transform_indices = @transform_3, window_bounds = array<i64: 16, 32>}, {transform_indices = @transform_4, window_bounds = array<i64: 16, 32>}, {transform_indices = @transform_5, window_bounds = array<i64: 16, 32>}, {transform_indices = @transform_6, window_bounds = array<i64: 1, 4, 16, 32>}, {transform_indices = @transform_7, window_bounds = array<i64: 1, 2, 16, 32>}, {transform_indices = @transform_8, window_bounds = array<i64: 1, 2, 16, 32>}]} {
    %c0 = arith.constant 0 : index
    %c0_0 = arith.constant 0 : index
    %c0_1 = arith.constant 0 : index
    %0 = vector.load %arg2[%c0, %c0_0, %c0_1] : memref<1x16x128xf32, #tpu.memory_space<vmem>>, vector<1x16x128xf32>
    %1 = vector.shape_cast %0 : vector<1x16x128xf32> to vector<16x128xf32>
    %2 = arith.truncf %1 : vector<16x128xf32> to vector<16x128xbf16>
    %c0_2 = arith.constant 0 : index
    %c0_3 = arith.constant 0 : index
    %3 = vector.load %arg3[%c0_2, %c0_3] : memref<128x448xbf16, #tpu.memory_space<vmem>>, vector<128x448xbf16>
    %cst = arith.constant dense<0.000000e+00> : vector<16x448xf32>
    %4 = tpu.matmul %2, %3, %cst {dimension_numbers = #tpu.dot_dimension_numbers<[1], [0], [0], [1], [0, 0, 1, 1], [], []>} : vector<16x128xbf16>, vector<128x448xbf16>, vector<16x448xf32> -> vector<16x448xf32>
    %c0_4 = arith.constant 0 : index
    %c0_5 = arith.constant 0 : index
    %5 = vector.load %arg4[%c0_4, %c0_5] : memref<16x32xbf16, #tpu.memory_space<vmem>>, vector<16x32xbf16>
    %6 = arith.extf %5 : vector<16x32xbf16> to vector<16x32xf32>
    %c0_6 = arith.constant 0 : index
    %c0_7 = arith.constant 0 : index
    %7 = vector.load %arg5[%c0_6, %c0_7] : memref<16x32xbf16, #tpu.memory_space<vmem>>, vector<16x32xbf16>
    %8 = arith.extf %7 : vector<16x32xbf16> to vector<16x32xf32>
    %c0_8 = arith.constant 0 : index
    %c0_9 = arith.constant 0 : index
    %9 = vector.load %arg6[%c0_8, %c0_9] : memref<16x32xbf16, #tpu.memory_space<vmem>>, vector<16x32xbf16>
    %10 = arith.extf %9 : vector<16x32xbf16> to vector<16x32xf32>
    %c0_10 = arith.constant 0 : index
    %c0_11 = arith.constant 0 : index
    %11 = vector.load %arg7[%c0_10, %c0_11] : memref<16x32xbf16, #tpu.memory_space<vmem>>, vector<16x32xbf16>
    %12 = arith.extf %11 : vector<16x32xbf16> to vector<16x32xf32>
    %13 = vector.extract_strided_slice %4 {offsets = [0, 0], sizes = [16, 32], strides = [1, 1]} : vector<16x448xf32> to vector<16x32xf32>
    %14 = vector.extract_strided_slice %4 {offsets = [0, 128], sizes = [16, 32], strides = [1, 1]} : vector<16x448xf32> to vector<16x32xf32>
    %15 = arith.mulf %13, %6 : vector<16x32xf32>
    %16 = arith.mulf %14, %8 : vector<16x32xf32>
    %17 = arith.addf %15, %16 : vector<16x32xf32>
    %18 = arith.truncf %17 : vector<16x32xf32> to vector<16x32xbf16>
    %c0_12 = arith.constant 0 : index
    %c0_13 = arith.constant 0 : index
    %c0_14 = arith.constant 0 : index
    %c0_15 = arith.constant 0 : index
    %19 = vector.load %arg8[%c0_12, %c0_13, %c0_14, %c0_15] : memref<1x4x16x32xbf16, #tpu.memory_space<vmem>>, vector<1x1x16x32xbf16>
    %20 = vector.shape_cast %19 : vector<1x1x16x32xbf16> to vector<16x32xbf16>
    %21 = vector.shape_cast %18 : vector<16x32xbf16> to vector<1x1x16x32xbf16>
    tpu.vector_store %arg8[%c0_12, %c0_13, %c0_14, %c0_15], %21 {strides = array<i32>} : memref<1x4x16x32xbf16, #tpu.memory_space<vmem>>, vector<1x1x16x32xbf16>,
    %22 = vector.extract_strided_slice %4 {offsets = [0, 32], sizes = [16, 32], strides = [1, 1]} : vector<16x448xf32> to vector<16x32xf32>
    %23 = vector.extract_strided_slice %4 {offsets = [0, 160], sizes = [16, 32], strides = [1, 1]} : vector<16x448xf32> to vector<16x32xf32>
    %24 = arith.mulf %22, %6 : vector<16x32xf32>
    %25 = arith.mulf %23, %8 : vector<16x32xf32>
    %26 = arith.addf %24, %25 : vector<16x32xf32>
    %27 = arith.truncf %26 : vector<16x32xf32> to vector<16x32xbf16>
    %c0_16 = arith.constant 0 : index
    %c1 = arith.constant 1 : index
    %c0_17 = arith.constant 0 : index
    %c0_18 = arith.constant 0 : index
    %28 = vector.load %arg8[%c0_16, %c1, %c0_17, %c0_18] : memref<1x4x16x32xbf16, #tpu.memory_space<vmem>>, vector<1x1x16x32xbf16>
    %29 = vector.shape_cast %28 : vector<1x1x16x32xbf16> to vector<16x32xbf16>
    %30 = vector.shape_cast %27 : vector<16x32xbf16> to vector<1x1x16x32xbf16>
    tpu.vector_store %arg8[%c0_16, %c1, %c0_17, %c0_18], %30 {strides = array<i32>} : memref<1x4x16x32xbf16, #tpu.memory_space<vmem>>, vector<1x1x16x32xbf16>,
    %31 = vector.extract_strided_slice %4 {offsets = [0, 64], sizes = [16, 32], strides = [1, 1]} : vector<16x448xf32> to vector<16x32xf32>
    %32 = vector.extract_strided_slice %4 {offsets = [0, 192], sizes = [16, 32], strides = [1, 1]} : vector<16x448xf32> to vector<16x32xf32>
    %33 = arith.mulf %31, %6 : vector<16x32xf32>
    %34 = arith.mulf %32, %8 : vector<16x32xf32>
    %35 = arith.addf %33, %34 : vector<16x32xf32>
    %36 = arith.truncf %35 : vector<16x32xf32> to vector<16x32xbf16>
    %c0_19 = arith.constant 0 : index
    %c2 = arith.constant 2 : index
    %c0_20 = arith.constant 0 : index
    %c0_21 = arith.constant 0 : index
    %37 = vector.load %arg8[%c0_19, %c2, %c0_20, %c0_21] : memref<1x4x16x32xbf16, #tpu.memory_space<vmem>>, vector<1x1x16x32xbf16>
    %38 = vector.shape_cast %37 : vector<1x1x16x32xbf16> to vector<16x32xbf16>
    %39 = vector.shape_cast %36 : vector<16x32xbf16> to vector<1x1x16x32xbf16>
    tpu.vector_store %arg8[%c0_19, %c2, %c0_20, %c0_21], %39 {strides = array<i32>} : memref<1x4x16x32xbf16, #tpu.memory_space<vmem>>, vector<1x1x16x32xbf16>,
    %40 = vector.extract_strided_slice %4 {offsets = [0, 96], sizes = [16, 32], strides = [1, 1]} : vector<16x448xf32> to vector<16x32xf32>
    %41 = vector.extract_strided_slice %4 {offsets = [0, 224], sizes = [16, 32], strides = [1, 1]} : vector<16x448xf32> to vector<16x32xf32>
    %42 = arith.mulf %40, %6 : vector<16x32xf32>
    %43 = arith.mulf %41, %8 : vector<16x32xf32>
    %44 = arith.addf %42, %43 : vector<16x32xf32>
    %45 = arith.truncf %44 : vector<16x32xf32> to vector<16x32xbf16>
    %c0_22 = arith.constant 0 : index
    %c3 = arith.constant 3 : index
    %c0_23 = arith.constant 0 : index
    %c0_24 = arith.constant 0 : index
    %46 = vector.load %arg8[%c0_22, %c3, %c0_23, %c0_24] : memref<1x4x16x32xbf16, #tpu.memory_space<vmem>>, vector<1x1x16x32xbf16>
    %47 = vector.shape_cast %46 : vector<1x1x16x32xbf16> to vector<16x32xbf16>
    %48 = vector.shape_cast %45 : vector<16x32xbf16> to vector<1x1x16x32xbf16>
    tpu.vector_store %arg8[%c0_22, %c3, %c0_23, %c0_24], %48 {strides = array<i32>} : memref<1x4x16x32xbf16, #tpu.memory_space<vmem>>, vector<1x1x16x32xbf16>,
    %49 = vector.extract_strided_slice %4 {offsets = [0, 256], sizes = [16, 32], strides = [1, 1]} : vector<16x448xf32> to vector<16x32xf32>
    %50 = vector.extract_strided_slice %4 {offsets = [0, 320], sizes = [16, 32], strides = [1, 1]} : vector<16x448xf32> to vector<16x32xf32>
    %51 = vector.extract_strided_slice %4 {offsets = [0, 384], sizes = [16, 32], strides = [1, 1]} : vector<16x448xf32> to vector<16x32xf32>
    %52 = arith.mulf %49, %10 : vector<16x32xf32>
    %53 = arith.mulf %50, %12 : vector<16x32xf32>
    %54 = arith.addf %52, %53 : vector<16x32xf32>
    %55 = arith.truncf %54 : vector<16x32xf32> to vector<16x32xbf16>
    %c0_25 = arith.constant 0 : index
    %c0_26 = arith.constant 0 : index
    %c0_27 = arith.constant 0 : index
    %c0_28 = arith.constant 0 : index
    %56 = vector.load %arg9[%c0_25, %c0_26, %c0_27, %c0_28] : memref<1x2x16x32xbf16, #tpu.memory_space<vmem>>, vector<1x1x16x32xbf16>
    %57 = vector.shape_cast %56 : vector<1x1x16x32xbf16> to vector<16x32xbf16>
    %58 = vector.shape_cast %55 : vector<16x32xbf16> to vector<1x1x16x32xbf16>
    tpu.vector_store %arg9[%c0_25, %c0_26, %c0_27, %c0_28], %58 {strides = array<i32>} : memref<1x2x16x32xbf16, #tpu.memory_space<vmem>>, vector<1x1x16x32xbf16>,
    %59 = arith.truncf %51 : vector<16x32xf32> to vector<16x32xbf16>
    %c0_29 = arith.constant 0 : index
    %c0_30 = arith.constant 0 : index
    %c0_31 = arith.constant 0 : index
    %c0_32 = arith.constant 0 : index
    %60 = vector.load %arg10[%c0_29, %c0_30, %c0_31, %c0_32] : memref<1x2x16x32xbf16, #tpu.memory_space<vmem>>, vector<1x1x16x32xbf16>
    %61 = vector.shape_cast %60 : vector<1x1x16x32xbf16> to vector<16x32xbf16>
    %62 = vector.shape_cast %59 : vector<16x32xbf16> to vector<1x1x16x32xbf16>
    tpu.vector_store %arg10[%c0_29, %c0_30, %c0_31, %c0_32], %62 {strides = array<i32>} : memref<1x2x16x32xbf16, #tpu.memory_space<vmem>>, vector<1x1x16x32xbf16>,
    %63 = vector.extract_strided_slice %4 {offsets = [0, 288], sizes = [16, 32], strides = [1, 1]} : vector<16x448xf32> to vector<16x32xf32>
    %64 = vector.extract_strided_slice %4 {offsets = [0, 352], sizes = [16, 32], strides = [1, 1]} : vector<16x448xf32> to vector<16x32xf32>
    %65 = vector.extract_strided_slice %4 {offsets = [0, 416], sizes = [16, 32], strides = [1, 1]} : vector<16x448xf32> to vector<16x32xf32>
    %66 = arith.mulf %63, %10 : vector<16x32xf32>
    %67 = arith.mulf %64, %12 : vector<16x32xf32>
    %68 = arith.addf %66, %67 : vector<16x32xf32>
    %69 = arith.truncf %68 : vector<16x32xf32> to vector<16x32xbf16>
    %c0_33 = arith.constant 0 : index
    %c1_34 = arith.constant 1 : index
    %c0_35 = arith.constant 0 : index
    %c0_36 = arith.constant 0 : index
    %70 = vector.load %arg9[%c0_33, %c1_34, %c0_35, %c0_36] : memref<1x2x16x32xbf16, #tpu.memory_space<vmem>>, vector<1x1x16x32xbf16>
    %71 = vector.shape_cast %70 : vector<1x1x16x32xbf16> to vector<16x32xbf16>
    %72 = vector.shape_cast %69 : vector<16x32xbf16> to vector<1x1x16x32xbf16>
    tpu.vector_store %arg9[%c0_33, %c1_34, %c0_35, %c0_36], %72 {strides = array<i32>} : memref<1x2x16x32xbf16, #tpu.memory_space<vmem>>, vector<1x1x16x32xbf16>,
    %73 = arith.truncf %65 : vector<16x32xf32> to vector<16x32xbf16>
    %c0_37 = arith.constant 0 : index
    %c1_38 = arith.constant 1 : index
    %c0_39 = arith.constant 0 : index
    %c0_40 = arith.constant 0 : index
    %74 = vector.load %arg10[%c0_37, %c1_38, %c0_39, %c0_40] : memref<1x2x16x32xbf16, #tpu.memory_space<vmem>>, vector<1x1x16x32xbf16>
    %75 = vector.shape_cast %74 : vector<1x1x16x32xbf16> to vector<16x32xbf16>
    %76 = vector.shape_cast %73 : vector<16x32xbf16> to vector<1x1x16x32xbf16>
    tpu.vector_store %arg10[%c0_37, %c1_38, %c0_39, %c0_40], %76 {strides = array<i32>} : memref<1x2x16x32xbf16, #tpu.memory_space<vmem>>, vector<1x1x16x32xbf16>,
    return
  }
  func.func @transform_0(%arg0: i32, %arg1: i32) -> (i32, i32, i32) {
    %c0_i32 = arith.constant 0 : i32
    %c0_i32_0 = arith.constant 0 : i32
    return %arg0, %arg1, %c0_i32 : i32, i32, i32
  }
  func.func @transform_1(%arg0: i32, %arg1: i32) -> (i32, i32) {
    %c0_i32 = arith.constant 0 : i32
    %c0_i32_0 = arith.constant 0 : i32
    %c0_i32_1 = arith.constant 0 : i32
    return %c0_i32, %c0_i32_0 : i32, i32
  }
  func.func @transform_2(%arg0: i32, %arg1: i32) -> (i32, i32) {
    %c0_i32 = arith.constant 0 : i32
    %c0_i32_0 = arith.constant 0 : i32
    return %arg1, %c0_i32 : i32, i32
  }
  func.func @transform_3(%arg0: i32, %arg1: i32) -> (i32, i32) {
    %c0_i32 = arith.constant 0 : i32
    %c0_i32_0 = arith.constant 0 : i32
    return %arg1, %c0_i32 : i32, i32
  }
  func.func @transform_4(%arg0: i32, %arg1: i32) -> (i32, i32) {
    %c0_i32 = arith.constant 0 : i32
    %c0_i32_0 = arith.constant 0 : i32
    return %arg1, %c0_i32 : i32, i32
  }
  func.func @transform_5(%arg0: i32, %arg1: i32) -> (i32, i32) {
    %c0_i32 = arith.constant 0 : i32
    %c0_i32_0 = arith.constant 0 : i32
    return %arg1, %c0_i32 : i32, i32
  }
  func.func @transform_6(%arg0: i32, %arg1: i32) -> (i32, i32, i32, i32) {
    %c0_i32 = arith.constant 0 : i32
    %c0_i32_0 = arith.constant 0 : i32
    %c0_i32_1 = arith.constant 0 : i32
    return %arg0, %c0_i32, %arg1, %c0_i32_0 : i32, i32, i32, i32
  }
  func.func @transform_7(%arg0: i32, %arg1: i32) -> (i32, i32, i32, i32) {
    %c0_i32 = arith.constant 0 : i32
    %c0_i32_0 = arith.constant 0 : i32
    %c0_i32_1 = arith.constant 0 : i32
    return %arg0, %c0_i32, %arg1, %c0_i32_0 : i32, i32, i32, i32
  }
  func.func @transform_8(%arg0: i32, %arg1: i32) -> (i32, i32, i32, i32) {
    %c0_i32 = arith.constant 0 : i32
    %c0_i32_0 = arith.constant 0 : i32
    %c0_i32_1 = arith.constant 0 : i32
    return %arg0, %c0_i32, %arg1, %c0_i32_0 : i32, i32, i32, i32
  }
}

</mosaic_0001>

<bundles_post_ra>
// kernel: tpu_custom_call.1
= control target key start
LH: loop header
LB: loop body
LE: loop exit
PB: predicated region body
PF: predicated region fallthrough
CT: control target
= control target key end

     0   :  { %s2140_s0 = inlined_call_operand.vmem [shape: f32[2,16,128], index: 0, kind: input, shape index: {}]   ;;  %s2141_s1 = inlined_call_operand.vmem [shape: bf16[128,448], index: 1, kind: input, shape index: {}]   ;;  %s2142_s2 = inlined_call_operand.vmem [shape: bf16[16,32], index: 2, kind: input, shape index: {}]   ;;  %s2143_s3 = inlined_call_operand.vmem [shape: bf16[16,32], index: 3, kind: input, shape index: {}]   ;;  %s2144_s4 = inlined_call_operand.vmem [shape: bf16[16,32], index: 4, kind: input, shape index: {}]   ;;  %s2145_s5 = inlined_call_operand.vmem [shape: bf16[16,32], index: 5, kind: input, shape index: {}]   ;;  %s2146_s6 = inlined_call_operand.hbm [shape: bf16[2,4,16,32], index: 6, kind: output, shape index: {0}]   ;;  %s2147_s7 = inlined_call_operand.hbm [shape: bf16[2,2,16,32], index: 7, kind: output, shape index: {1}]   ;;  %s2148_s8 = inlined_call_operand.hbm [shape: bf16[2,2,16,32], index: 8, kind: output, shape index: {2}]  }
   0x1   :  { %2156 = sst [smem:[#allocation9_spill]] %s2140_s0 }
   0x2   :  { %2157 = sst [smem:[#allocation10_spill]] %s2141_s1 }
   0x3   :  { %14 = vsyncpa [#allocation3], 0 }
   0x4   :  { %16 = vsyncpa [#allocation3 + $0x1], 0 }
   0x5   :  { %17 = vsyncpa [#allocation5], 0 }
   0x6   :  { %19 = vsyncpa [#allocation5 + $0x1], 0  ;;  %s1692_s27 = smov 0   ;;  %s1694_s28 = smov 0  }
   0x7   :  { %s1696_s29 = smov 0   ;;  %s1698_s30 = smov 0  }
   0x8   :  { %s1700_s9 = smov 0   ;;  %s1702_s10 = smov 0  }
   0x9 LB: > { %s2150_s11 = sadd.s32 4294967295, %s1637_s10   ;;  %s2149_s12 = sadd.s32 4294967294, %s1637_s10   ;;  %s1637_s10 = sphi %s1702_s10, %s25_s10   ;;  %s1633_s9 = sphi %s1700_s9, %s2175_s9   ;;  %s1629_s30 = sphi %s1698_s30, %s2174_s30   ;;  %s1625_s29 = sphi %s1696_s29, %s2173_s29   ;;  %s1621_s28 = sphi %s1694_s28, %s2172_s28   ;;  %s1617_s27 = sphi %s1692_s27, %s2171_s27  }
   0xa   : > { %s37_s13 = sadd.s32 1, %s1633_s9  ;;  %s199_s14 = sadd.s32 1, %s1625_s29 }
   0xb   : > { %p39_p0 = scmp.ge.s32.totalorder %s37_s13, 2  ;;  %p209_p1 = scmp.ne.s32.totalorder %s1625_s29, %s1621_s28 }
   0xc   : > { %p210_p2 = scmp.eq.s32.totalorder %s2150_s11, 1  ;;  %p215_p3 = scmp.ne.s32.totalorder %s1621_s28, %s1617_s27 }
   0xd   : > { %s2177_s13 = smov (%p39_p0, %s37_s13), 0  ;;  %p216_p5 = scmp.eq.s32.totalorder %s2149_s12, 1 }
   0xe   : > { %p1734_p4 = por %p210_p2, %p209_p1  ;;  %s194_s16 = ssub.s32 %s1633_s9, %s2177_s13 }
   0xf   : > { %p1235_p6 = scmp.ge.s32.totalorder %s1637_s10, 1  ;;  %p197_p7 = scmp.eq.s32.totalorder %s194_s16, 0 }
  0x10   : > { %p1743_p8 = por %p216_p5, %p215_p3  ;;  %p342_p9 = scmp.lt.s32.totalorder %s1637_s10, 3 }
  0x11   : > { %s1749_s18 = scalar_select %p197_p7, %s1625_s29, %s199_s14  }
  0x12   : > { %p343_p10 = pnand %p1235_p6, %p342_p9 }
  0x13   : > { %s2160_s1 = sld [smem:[#allocation10_spill]] (!%p343_p10)  ;;  %p411_p11 = scmp.lt.s32.totalorder (!%p343_p10), %s1629_s30, 1 }
  0x14   : > { %346 = sbr.rel (%p343_p10) target bundleno = 530 (0x212), region = 44  ;;  %s1640_s26 = smov (!%p343_p10), 96  }
  0x15   : > { %s2161_s0 = sld [smem:[#allocation9_spill]] (!%p343_p10)  ;;  %s1641_s23 = smov (!%p343_p10), 32  }
  0x16   : > { %s2151_s14 = smov (!%p343_p10), 64   ;;  %s1323_s16 = sshll.u32 (!%p343_p10), %s1629_s30, 9 }
  0x17   : > { %s2000_s20 = scalar_lea.hbm (!%p343_p10), %s2146_s6, %s1323_s16 }
  0x19   : > { %v1457_v0 = vld [vmem:[%s2160_s1 + $0xec] ss:$16 sps:$4 sm:$0xff]   ;;  %v1459_v1 = vld [vmem:[%s2160_s1 + $0xe8] ss:$16 sps:$4 sm:$0xff]   ;;  %v1639_v2 = vmov 0   ;;  %s1801_s21 = scalar_select %p411_p11, %s1629_s30, 1 }
  0x1a   : > { %718 = vmatprep.mubr.bf16.mxu1 %v1639_v2  ;;  %675 = vmatprep.mubr.bf16.mxu0 %v1639_v2  ;;  %v1460_v3 = vld [vmem:[%s2160_s1 + $0xcc] ss:$16 sps:$4 sm:$0xff]   ;;  %v1462_v4 = vld [vmem:[%s2160_s1 + $0xc8] ss:$16 sps:$4 sm:$0xff]   ;;  %v1481_v10 = vld [vmem:[%s2160_s1 + $0xe4] ss:$16 sps:$4 sm:$0xff]  }
  0x1b   : > { %686 = vmatprep.subr.bf16.mxu1 %v1457_v0  ;;  %v1463_v5 = vld [vmem:[%s2160_s1 + $0xac] ss:$16 sps:$4 sm:$0xff]   ;;  %v1465_v6 = vld [vmem:[%s2160_s1 + $0xa8] ss:$16 sps:$4 sm:$0xff]   ;;  %v1483_v11 = vld [vmem:[%s2160_s1 + $0xe0] ss:$16 sps:$4 sm:$0xff]   ;;  %643 = vmatprep.subr.bf16.mxu0 %v1481_v10 }
  0x1c   : > { %687 = vmatpush1.bf16.msra.mxu1 %v1459_v1  ;;  %v1466_v7 = vld [vmem:[%s2160_s1 + $0x8c] ss:$16 sps:$4 sm:$0xff]   ;;  %v1468_v8 = vld [vmem:[%s2160_s1 + $0x88] ss:$16 sps:$4 sm:$0xff]   ;;  %v1484_v12 = vld [vmem:[%s2160_s1 + $0xc4] ss:$16 sps:$4 sm:$0xff]   ;;  %644 = vmatpush1.bf16.msra.mxu0 %v1483_v11 }
  0x1d   : > { %688 = vmatprep.subr.bf16.mxu1 %v1460_v3  ;;  %v1469_v9 = vld [vmem:[%s2160_s1 + $0x6c] ss:$16 sps:$4 sm:$0xff]   ;;  %v1471_v13 = vld [vmem:[%s2160_s1 + $0x68] ss:$16 sps:$4 sm:$0xff]   ;;  %v1486_v14 = vld [vmem:[%s2160_s1 + $0xc0] ss:$16 sps:$4 sm:$0xff]   ;;  %645 = vmatprep.subr.bf16.mxu0 %v1484_v12 }
  0x1e   : > { %v1472_v15 = vld [vmem:[%s2160_s1 + $0x4c] ss:$16 sps:$4 sm:$0xff]   ;;  %v1487_v16 = vld [vmem:[%s2160_s1 + $0xa4] ss:$16 sps:$4 sm:$0xff]   ;;  %v1474_v18 = vld [vmem:[%s2160_s1 + $0x48] ss:$16 sps:$4 sm:$0xff]  }
  0x1f   : > { %v1339_v17 = vld [vmem:[%s2145_s5] sm:$0xff]   ;;  %v1475_v21 = vld [vmem:[%s2160_s1 + $0x2c] ss:$16 sps:$4 sm:$0xff]   ;;  %s1308_s25 = sshll.u32 %s1801_s21, 4  ;;  %v1477_v30 = vld [vmem:[%s2160_s1 + $0x28] ss:$16 sps:$4 sm:$0xff]  }
  0x20   : > { %689 = vmatpush1.bf16.msra.mxu1 %v1462_v4  ;;  %v1340_v19 = vunpack.c.l.bf16 %v1339_v17  ;;  %v1341_v20 = vunpack.c.h.bf16 %v1339_v17  ;;  %646 = vmatpush1.bf16.msra.mxu0 %v1486_v14  ;;  %v1489_v22 = vld [vmem:[%s2160_s1 + $0xa0] ss:$16 sps:$4 sm:$0xff]   ;;  %v1490_v24 = vld [vmem:[%s2160_s1 + $0x84] ss:$16 sps:$4 sm:$0xff]   ;;  %v1478_v35 = vld [vmem:[%s2160_s1 + $0xc] ss:$16 sps:$4 sm:$0xff]   ;;  %s418_s12 = scalar_lea.vmem %s2161_s0, %s1308_s25 }
  0x21   : > { %690 = vmatprep.subr.bf16.mxu1 %v1463_v5  ;;  %v1818_v23 = vld [vmem:[%s2144_s4] sm:$0xff]   ;;  %647 = vmatprep.subr.bf16.mxu0 %v1487_v16  ;;  %v1480_v39 = vld [vmem:[%s2160_s1 + $0x8] ss:$16 sps:$4 sm:$0xff]   ;;  %vm759_vm0 = vcmask 257024  }
  0x22   : > { %v1412_v25 = vpack.i.bf16 %v1341_v20, %v1340_v19  ;;  %v1336_v26 = vunpack.c.l.bf16 %v1818_v23  ;;  %v1337_v27 = vunpack.c.h.bf16 %v1818_v23  ;;  %v1834_v29 = vld [vmem:[%s2143_s3] sm:$0xff]   ;;  %v449_v43 = vld [vmem:[%s418_s12 + $0x8] sm:$0xff] }
  0x23   : > { %v1492_v31 = vld [vmem:[%s2160_s1 + $0x80] ss:$16 sps:$4 sm:$0xff]   ;;  %v1332_v32 = vunpack.c.l.bf16 %v1834_v29  ;;  %v1333_v33 = vunpack.c.h.bf16 %v1834_v29  ;;  %v1493_v36 = vld [vmem:[%s2160_s1 + $0x64] ss:$16 sps:$4 sm:$0xff]  }
  0x24   : > { %691 = vmatpush1.bf16.msra.mxu1 %v1465_v6  ;;  %1413 = vrot.lane.b32.xlu0 %v1412_v25, %s1640_s26  ;;  %v1422_v28 = vpack.i.bf16 %v1337_v27, %v1336_v26  ;;  %v1847_v34 = vld [vmem:[%s2142_s2] sm:$0xff]  }
  0x25   : > { %692 = vmatprep.subr.bf16.mxu1 %v1466_v7  ;;  %648 = vmatpush1.bf16.msra.mxu0 %v1489_v22  ;;  %v1328_v37 = vunpack.c.l.bf16 %v1847_v34  ;;  %v1329_v38 = vunpack.c.h.bf16 %v1847_v34  ;;  %v1432_v40 = vpack.i.bf16 %v1333_v33, %v1332_v32  ;;  %v448_v42 = vld [vmem:[%s418_s12] sm:$0xff]  ;;  %s1901_s12 = sand.u32 1, %s1621_s28  }
  0x26   : > { %649 = vmatprep.subr.bf16.mxu0 %v1490_v24  ;;  %1423 = vrot.lane.b32.xlu1 %v1422_v28, %s1641_s23  ;;  %v1495_v44 = vld [vmem:[%s2160_s1 + $0x60] ss:$16 sps:$4 sm:$0xff]   ;;  %v1496_v45 = vld [vmem:[%s2160_s1 + $0x44] ss:$16 sps:$4 sm:$0xff]   ;;  %v450_v46 = vpack.c.bf16 %v449_v43, %v448_v42  ;;  %s1237_s21 = sshll.u32 %s1901_s12, 4  ;;  %s1236_s24 = sshll.u32 %s1901_s12, 5 }
  0x27   : > { %v1427_v41 = vpack.i.bf16 %v1329_v38, %v1328_v37  ;;  %v1498_v47 = vld [vmem:[%s2160_s1 + $0x40] ss:$16 sps:$4 sm:$0xff]   ;;  %v1499_v48 = vld [vmem:[%s2160_s1 + $0x24] ss:$16 sps:$4 sm:$0xff]   ;;  %s1919_s22 = scalar_lea.vmem [#allocation6], %s1237_s21  ;;  %s1949_s25 = scalar_lea.vmem [#allocation2], %s1236_s24 }
  0x28   : > { %693 = vmatpush1.bf16.msra.mxu1 %v1468_v8  ;;  %1418 = vrot.lane.b32.xlu0 %v1412_v25, %s2151_s14  ;;  %v1501_v49 = vld [vmem:[%s2160_s1 + $0x20] ss:$16 sps:$4 sm:$0xff]   ;;  %v1502_v50 = vld [vmem:[%s2160_s1 + $0x4] ss:$16 sps:$4 sm:$0xff]   ;;  %s985_s11 = sshll.u32 %s1949_s25, 4  ;;  %s1993_s11 = int_to_ptr.vmem [resolvable:$true] %s985_s11 }
  0x29   : > { %694 = vmatprep.subr.bf16.mxu1 %v1469_v9  ;;  %650 = vmatpush1.bf16.msra.mxu0 %v1492_v31  ;;  %v1504_v51 = vld [vmem:[%s2160_s1] ss:$16 sps:$4 sm:$0xff]   ;;  %s1505_s24 = scalar_lea.vmem %s1993_s11, 512 }
  0x2a   : > { %651 = vmatprep.subr.bf16.mxu0 %v1493_v36  ;;  %1428 = vrot.lane.b32.xlu1 %v1427_v41, %s1641_s23  ;;  %p1506_p12 = scmp.ne.s32.totalorder %s1993_s11, %s1505_s24 }
  0x2c   : > { %695 = vmatpush1.bf16.msra.mxu1 %v1471_v13  ;;  %1433 = vrot.lane.b32.xlu0 %v1432_v40, %s1641_s23  ;;  %p1507_p13 = pnand %p1506_p12, %p1734_p4 }
  0x2d   : > { %696 = vmatprep.subr.bf16.mxu1 %v1472_v15  ;;  %652 = vmatpush1.bf16.msra.mxu0 %v1495_v44 }
  0x2e   : > { %653 = vmatprep.subr.bf16.mxu0 %v1496_v45  ;;  %1438 = vrot.lane.b32.xlu1 %v1427_v41, %s2151_s14  ;;  %p1508_p0 = pneg %p1507_p13 }
  0x30   : > { %697 = vmatpush1.bf16.msra.mxu1 %v1474_v18  ;;  %1443 = vrot.lane.b32.xlu0 %v1432_v40, %s2151_s14 }
  0x31   : > { %698 = vmatprep.subr.bf16.mxu1 %v1475_v21  ;;  %654 = vmatpush1.bf16.msra.mxu0 %v1498_v47 }
  0x32   : > { %655 = vmatprep.subr.bf16.mxu0 %v1499_v48  ;;  %1448 = vrot.lane.b32.xlu1 %v1427_v41, %s1640_s26 }
  0x34   : > { %699 = vmatpush1.bf16.msra.mxu1 %v1477_v30  ;;  %1453 = vrot.lane.b32.xlu0 %v1432_v40, %s1640_s26 }
  0x35   : > { %700 = vmatprep.subr.bf16.mxu1 %v1478_v35  ;;  %656 = vmatpush1.bf16.msra.mxu0 %v1501_v49 }
  0x36   : > { %657 = vmatprep.subr.bf16.mxu0 %v1502_v50 }
  0x38   : > { %701 = vmatpush1.bf16.msra.mxu1 %v1480_v39 }
  0x39   : > { %658 = vmatpush1.bf16.msra.mxu0 %v1504_v51 }
  0x3b   : > { %719 = vmatmul.mubr.bf16.vlgmr.msra.gmra.mxu1 %v450_v46 }
  0x3c   : > { %676 = vmatmul.mubr.bf16.vlgmr.msra.gmra.mxu0 %v450_v46 }
  0x96   : > { %v1414_v52 = vpop.permute.xlu0 %1413 }
  0x97   : > { %v1415_v55 = vunpack.i.l.bf16 %v1414_v52  ;;  %v1416_v59 = vunpack.i.h.bf16 %v1414_v52 }
  0x98   : > { %v1424_v53 = vpop.permute.xlu1 %1423 }
  0x99   : > { %v1425_v56 = vunpack.i.l.bf16 %v1424_v53  ;;  %v1426_v62 = vunpack.i.h.bf16 %v1424_v53 }
  0x9a   : > { %v1419_v54 = vpop.permute.xlu0 %1418 }
  0x9b   : > { %v1420_v61 = vunpack.i.l.bf16 %v1419_v54  ;;  %v1421_v4 = vunpack.i.h.bf16 %v1419_v54 }
  0x9c   : > { %v1429_v58 = vpop.permute.xlu1 %1428 }
  0x9d   : > { %v1430_v13 = vunpack.i.l.bf16 %v1429_v58  ;;  %v1431_v22 = vunpack.i.h.bf16 %v1429_v58 }
  0x9e   : > { %v1904_v57 = vpop.permute.xlu0 %1433 }
  0x9f   : > { %v1435_v15 = vunpack.i.l.bf16 %v1904_v57  ;;  %v1436_v21 = vunpack.i.h.bf16 %v1904_v57 }
  0xa0   : > { %v1439_v8 = vpop.permute.xlu1 %1438 }
  0xa1   : > { %v1440_v14 = vunpack.i.l.bf16 %v1439_v8  ;;  %v1441_v24 = vunpack.i.h.bf16 %v1439_v8 }
  0xa2   : > { %v1444_v7 = vpop.permute.xlu0 %1443 }
  0xa3   : > { %v1445_v16 = vunpack.i.l.bf16 %v1444_v7  ;;  %v1446_v40 = vunpack.i.h.bf16 %v1444_v7 }
  0xa4   : > { %v1449_v18 = vpop.permute.xlu1 %1448 }
  0xa5   : > { %v1450_v35 = vunpack.i.l.bf16 %v1449_v18  ;;  %v1451_v44 = vunpack.i.h.bf16 %v1449_v18 }
  0xa6   : > { %v1454_v17 = vpop.permute.xlu0 %1453 }
  0xa7   : > { %v1455_v31 = vunpack.i.l.bf16 %v1454_v17  ;;  %v1456_v43 = vunpack.i.h.bf16 %v1454_v17 }
  0xfb   : > { %v1906_v60 = vpop.f32.mrf.mxu1 }
  0xfc   : > { %v923_v63 = vmul.f32 %v1415_v55, %v1906_v60  ;;  %v1910_v0 = vmul.f32 %v1425_v56, %v1906_v60  ;;  %v875_v5 = vmul.f32 %v1420_v61, %v1906_v60  ;;  %v677_v19 = vpop.f32.mrf.mxu0 }
  0xfd   : > { %v722_v1 = vpop.f32.mrf.mxu1  ;;  %v745_v20 = vmul.f32 %v1328_v37, %v677_v19  ;;  %v770_v28 = vmul.f32 %v1430_v13, %v677_v19  ;;  %v805_v30 = vmul.f32 %v1440_v14, %v677_v19  ;;  %v838_v50 = vmul.f32 %v1450_v35, %v677_v19 }
  0xfe   : > { %v1912_v2 = vpack.c.bf16 %v722_v1, %v722_v1  ;;  %927 = vrot.lane.b32.xlu1 %v923_v63, %s2151_s14  ;;  %v679_v25 = vpop.f32.mrf.mxu0 }
  0xff   : > { %v1915_v3 = vpop.f32.mrf.mxu1  ;;  %v747_v36 = vmul.f32 %v1332_v32, %v679_v25  ;;  %v780_v39 = vmul.f32 %v1435_v15, %v679_v25  ;;  %v813_v41 = vmul.f32 %v1445_v16, %v679_v25  ;;  %v846_v49 = vmul.f32 %v1455_v31, %v679_v25 }
 0x100   : > { %905 = vst.msk [vmem:[%s1919_s22] sm:$0xf] %vm759_vm0, %v1912_v2  ;;  %v924_v6 = vmul.f32 %v1416_v59, %v1915_v3  ;;  %v1927_v9 = vmul.f32 %v1426_v62, %v1915_v3  ;;  %v876_v12 = vmul.f32 %v1421_v4, %v1915_v3  ;;  %v681_v42 = vpop.f32.mrf.mxu0 }
 0x101   : > { %v726_v10 = vpop.f32.mrf.mxu1  ;;  %v749_v37 = vadd.f32 %v747_v36, %v745_v20  ;;  %v746_v45 = vmul.f32 %v1329_v38, %v681_v42  ;;  %v771_v46 = vmul.f32 %v1431_v22, %v681_v42  ;;  %v806_v47 = vmul.f32 %v1441_v24, %v681_v42 }
 0x102   : > { %v1929_v11 = vpack.c.bf16 %v726_v10, %v726_v10  ;;  %879 = vrot.lane.b32.xlu1 %v875_v5, %s2151_s14  ;;  %929 = vrot.lane.b32.xlu0 %v924_v6, %s2151_s14  ;;  %v683_v48 = vpop.f32.mrf.mxu0  ;;  %v782_v51 = vadd.f32 %v780_v39, %v770_v28  ;;  %v815_v52 = vadd.f32 %v813_v41, %v805_v30 }
 0x103   : > { %v1309_v53 = vpack.c.bf16 %v749_v37, %v749_v37  ;;  %v748_v32 = vmul.f32 %v1333_v33, %v683_v48  ;;  %v781_v54 = vmul.f32 %v1436_v21, %v683_v48  ;;  %v814_v55 = vmul.f32 %v1446_v40, %v683_v48 }
 0x104   : > { %906 = vst.msk [vmem:[%s1919_s22 + $0x4] sm:$0xf] %vm759_vm0, %v1929_v11  ;;  %v839_v56 = vmul.f32 %v1451_v44, %v681_v42  ;;  %v1311_v57 = vpack.c.bf16 %v782_v51, %v782_v51  ;;  %v847_v38 = vmul.f32 %v1456_v43, %v683_v48  ;;  %v1313_v61 = vpack.c.bf16 %v815_v52, %v815_v52 }
 0x105   : > { %760 = vst.msk [vmem:[%s1949_s25] sm:$0xf] %vm759_vm0, %v1309_v53  ;;  %v750_v34 = vadd.f32 %v748_v32, %v746_v45  ;;  %v783_v58 = vadd.f32 %v781_v54, %v771_v46  ;;  %v816_v59 = vadd.f32 %v814_v55, %v806_v47  ;;  %v848_v62 = vadd.f32 %v846_v49, %v838_v50 }
 0x106   : > { %881 = vrot.lane.b32.xlu0 %v876_v12, %s2151_s14  ;;  %790 = vrot.lane.b32.xlu1 %v1311_v57, %s1640_s26  ;;  %v849_v1 = vadd.f32 %v847_v38, %v839_v56  ;;  %v865_v10 = vmul.f32 %v1336_v26, %v1906_v60 }
 0x107   : > { %v1310_v29 = vpack.c.bf16 %v750_v34, %v750_v34  ;;  %v1312_v33 = vpack.c.bf16 %v783_v58, %v783_v58  ;;  %v1314_v63 = vpack.c.bf16 %v816_v59, %v816_v59  ;;  %v1315_v4 = vpack.c.bf16 %v848_v62, %v848_v62 }
 0x108   : > { %v1316_v5 = vpack.c.bf16 %v849_v1, %v849_v1 }
 0x109   : > { %761 = vst.msk [vmem:[%s1949_s25 + $0x4] sm:$0xf] %vm759_vm0, %v1310_v29 }
 0x10a   : > { %792 = vrot.lane.b32.xlu0 %v1312_v33, %s1640_s26  ;;  %823 = vrot.lane.b32.xlu1 %v1313_v61, %s2151_s14 }
 0x10e   : > { %825 = vrot.lane.b32.xlu0 %v1314_v63, %s2151_s14  ;;  %856 = vrot.lane.b32.xlu1 %v1315_v4, %s1641_s23  ;;  %s1643_s14 = smov [#allocation2]  }
 0x10f   : > { %s1509_s0 = sshll.u32 %s1643_s14, 4  ;;  %s1510_s0 = int_to_ptr.vmem [resolvable:$false] %s1509_s0 }
 0x110   : > { %s1511_s1 = scalar_lea.vmem %s1510_s0, 1024  ;;  %p1512_p1 = scmp.lt.s32.totalorder %s1993_s11, %s1510_s0 }
 0x111   : > { %p1513_p2 = scmp.lt.s32.totalorder %s1511_s1, %s1505_s24 }
 0x112   : > { %858 = vrot.lane.b32.xlu0 %v1316_v5, %s1641_s23  ;;  %s1972_s23 = scalar_lea.vmem [#allocation4], %s1237_s21 }
 0x113   : > { %p1514_p3 = por %p1513_p2, %p1512_p1 }
 0x115   : > { %p1515_p5 = pnand %p1514_p3, %p1508_p0 }
 0x170   : > { %v928_v6 = vpop.permute.xlu1 %927 }
 0x171   : > { %v933_v7 = vadd.f32 %v928_v6, %v1910_v0  ;;  %v866_v0 = vmul.f32 %v1337_v27, %v1915_v3 }
 0x173   : > { %v1321_v8 = vpack.c.bf16 %v933_v7, %v933_v7 }
 0x174   : > { %v880_v12 = vpop.permute.xlu1 %879  ;;  %v930_v13 = vpop.permute.xlu0 %929 }
 0x175   : > { %v885_v14 = vadd.f32 %v880_v12, %v865_v10  ;;  %v934_v15 = vadd.f32 %v930_v13, %v1927_v9  ;;  %941 = vrot.lane.b32.xlu1 %v1321_v8, %s1640_s26 }
 0x177   : > { %v1317_v16 = vpack.c.bf16 %v885_v14, %v885_v14  ;;  %v1322_v17 = vpack.c.bf16 %v934_v15, %v934_v15 }
 0x178   : > { %v882_v18 = vpop.permute.xlu0 %881  ;;  %v791_v27 = vpop.permute.xlu1 %790 }
 0x179   : > { %895 = vst.msk [vmem:[%s1972_s23] sm:$0xf] %vm759_vm0, %v1317_v16  ;;  %v886_v26 = vadd.f32 %v882_v18, %v866_v0  ;;  %950 = vrot.lane.b32.xlu1 %v1912_v2, %s1640_s26  ;;  %943 = vrot.lane.b32.xlu0 %v1322_v17, %s1640_s26  ;;  %1277 = vst.msk [vmem:[%s1949_s25 + $0x8] sm:$0xf] %vm759_vm0, %v791_v27 }
 0x17b   : > { %v1318_v23 = vpack.c.bf16 %v886_v26, %v886_v26 }
 0x17c   : > { %v793_v60 = vpop.permute.xlu0 %792  ;;  %v824_v3 = vpop.permute.xlu1 %823 }
 0x17d   : > { %896 = vst.msk [vmem:[%s1972_s23 + $0x4] sm:$0xf] %vm759_vm0, %v1318_v23  ;;  %952 = vrot.lane.b32.xlu0 %v1929_v11, %s1640_s26  ;;  %1278 = vst.msk [vmem:[%s1949_s25 + $0xc] sm:$0xf] %vm759_vm0, %v793_v60 }
 0x17e   : > { %1281 = vst.msk [vmem:[%s1949_s25 + $0x10] sm:$0xf] %vm759_vm0, %v824_v3 }
 0x180   : > { %v826_v2 = vpop.permute.xlu0 %825  ;;  %v857_v9 = vpop.permute.xlu1 %856 }
 0x181   : > { %1282 = vst.msk [vmem:[%s1949_s25 + $0x14] sm:$0xf] %vm759_vm0, %v826_v2  ;;  %1285 = vst.msk [vmem:[%s1949_s25 + $0x18] sm:$0xf] %vm759_vm0, %v857_v9 }
 0x184   : > { %v859_v11 = vpop.permute.xlu0 %858 }
 0x185   : > { %1286 = vst.msk [vmem:[%s1949_s25 + $0x1c] sm:$0xf] %vm759_vm0, %v859_v11 }
 0x186   : > { %1518 = shalt.err (!%p1515_p5)
}
 0x187   : > { %s1519_s25 = scalar_lea.hbm %s2000_s20, 512  ;;  %s1523_s14 = scalar_lea.hbm %s2146_s6, 1024 }
 0x188   : > { %p1520_p6 = scmp.ne.s32.totalorder %s2000_s20, %s1519_s25  ;;  %p1524_p10 = scmp.lt.s32.totalorder %s2000_s20, %s2146_s6 }
 0x189   : > { %p1525_p11 = scmp.lt.s32.totalorder %s1523_s14, %s1519_s25 }
 0x18a   : > { %p1521_p7 = pnand %p1520_p6, %p1734_p4 }
 0x18b   : > { %p1526_p12 = por %p1525_p11, %p1524_p10 }
 0x18c   : > { %p1522_p9 = pneg %p1521_p7 }
 0x18e   : > { %p1527_p13 = pnand %p1526_p12, %p1522_p9 }
 0x190   : > { %1530 = shalt.err (!%p1527_p13)
}
 0x191   : > { %s2154_s0 = smov 4   ;;  %s2162_s1 = smov 64  }
 0x192   : > { %s2163_s24 = scalar_lea.sflag [#allocation3], %s1901_s12  ;;  %s1003_s21 = sshll.u32 %s1972_s23, 4  ;;  %s2038_s21 = int_to_ptr.vmem [resolvable:$true] %s1003_s21 }
 0x193   : > { %1342 = dma.vmem_to_hbm [thread:$0]  (%p1734_p4), %s1993_s11, 512, %s2000_s20, %s2163_s24, %s2162_s1, %s2162_s1, %s2154_s0  }
 0x194   : > { %s2164_s25 = sadd.s32 4294967295, %s1637_s10   ;;  %s2153_s26 = sshll.u32 %s1629_s30, 8 }
 0x195   : > { %s2033_s16 = sand.u32 1, %s2164_s25   ;;  %s2045_s11 = scalar_lea.hbm %s2147_s7, %s2153_s26 }
 0x196   : > { %s1531_s24 = scalar_lea.vmem %s2038_s21, 256  ;;  %s1645_s25 = smov [#allocation4]  }
 0x197   : > { %p1532_p0 = scmp.ne.s32.totalorder %s2038_s21, %s1531_s24  ;;  %s1535_s12 = sshll.u32 %s1645_s25, 4  ;;  %s1536_s12 = int_to_ptr.vmem [resolvable:$false] %s1535_s12 }
 0x198   : > { %s1537_s14 = scalar_lea.vmem %s1536_s12, 512  ;;  %p1538_p3 = scmp.lt.s32.totalorder %s2038_s21, %s1536_s12 }
 0x199   : > { %p1533_p1 = pnand %p1532_p0, %p1734_p4  ;;  %p1539_p5 = scmp.lt.s32.totalorder %s1537_s14, %s1531_s24 }
 0x19b   : > { %p1534_p2 = pneg %p1533_p1  ;;  %p1540_p6 = por %p1539_p5, %p1538_p3 }
 0x19d   : > { %p1541_p7 = pnand %p1540_p6, %p1534_p2 }
 0x1e7   : > { %v942_v19 = vpop.permute.xlu1 %941 }
 0x1e8   : > { %1293 = vst.msk [vmem:[%s1972_s23 + $0x8] sm:$0xf] %vm759_vm0, %v942_v19 }
 0x1eb   : > { %v951_v20 = vpop.permute.xlu1 %950  ;;  %v944_v21 = vpop.permute.xlu0 %943 }
 0x1ec   : > { %1295 = vst.msk [vmem:[%s1919_s22 + $0x8] sm:$0xf] %vm759_vm0, %v951_v20  ;;  %1294 = vst.msk [vmem:[%s1972_s23 + $0xc] sm:$0xf] %vm759_vm0, %v944_v21 }
 0x1ed   : > { %1544 = shalt.err (!%p1541_p7)
}
 0x1ee   : > { %s1545_s23 = scalar_lea.hbm %s2045_s11, 256  ;;  %s1549_s25 = scalar_lea.hbm %s2147_s7, 512 }
 0x1ef   : > { %p1546_p9 = scmp.ne.s32.totalorder %s2045_s11, %s1545_s23  ;;  %p1550_p12 = scmp.lt.s32.totalorder %s2045_s11, %s2147_s7 }
 0x1f0   : > { %p1551_p13 = scmp.lt.s32.totalorder %s1549_s25, %s1545_s23 }
 0x1f1   : > { %p1547_p10 = pnand %p1546_p9, %p1734_p4 }
 0x1f2   : > { %p1552_p0 = por %p1551_p13, %p1550_p12 }
 0x1f3   : > { %p1548_p11 = pneg %p1547_p10 }
 0x1f5   : > { %p1553_p1 = pnand %p1552_p0, %p1548_p11 }
 0x1f7   : > { %1556 = shalt.err (!%p1553_p1)
}
 0x1f8   : > { %s2165_s24 = smov 4   ;;  %s2166_s12 = scalar_lea.sflag [#allocation5], %s2033_s16  ;;  %v953_v22 = vpop.permute.xlu0 %952 }
 0x1f9   : > { %1343 = dma.vmem_to_hbm [thread:$0]  (%p1734_p4), %s2038_s21, 256, %s2045_s11, %s2166_s12, %s2162_s1, %s2162_s1, %s2165_s24  }
 0x1fa   : > { %s2167_s0 = sshll.u32 %s1919_s22, 4  ;;  %s2168_s26 = sshll.u32 %s1629_s30, 8  ;;  %1296 = vst.msk [vmem:[%s1919_s22 + $0xc] sm:$0xf] %vm759_vm0, %v953_v22  ;;  %s2080_s0 = int_to_ptr.vmem [resolvable:$true] %s2167_s0 }
 0x1fb   : > { %s2087_s14 = scalar_lea.hbm %s2148_s8, %s2168_s26  ;;  %s1557_s23 = scalar_lea.vmem %s2080_s0, 256 }
 0x1fc   : > { %p1558_p2 = scmp.ne.s32.totalorder %s2080_s0, %s1557_s23  ;;  %s1646_s21 = smov [#allocation6]  }
 0x1fd   : > { %s1561_s11 = sshll.u32 %s1646_s21, 4  ;;  %s1562_s11 = int_to_ptr.vmem [resolvable:$false] %s1561_s11 }
 0x1fe   : > { %p1559_p3 = pnand %p1558_p2, %p1734_p4  ;;  %s1563_s30 = scalar_lea.vmem %s1562_s11, 512 }
 0x1ff   : > { %p1564_p6 = scmp.lt.s32.totalorder %s2080_s0, %s1562_s11  ;;  %p1565_p7 = scmp.lt.s32.totalorder %s1563_s30, %s1557_s23 }
 0x200   : > { %p1560_p5 = pneg %p1559_p3 }
 0x201   : > { %p1566_p9 = por %p1565_p7, %p1564_p6 }
 0x203   : > { %p1567_p10 = pnand %p1566_p9, %p1560_p5 }
 0x205   : > { %1570 = shalt.err (!%p1567_p10)
}
 0x206   : > { %s1571_s25 = scalar_lea.hbm %s2087_s14, 256  ;;  %s1575_s26 = scalar_lea.hbm %s2148_s8, 512 }
 0x207   : > { %p1572_p11 = scmp.ne.s32.totalorder %s2087_s14, %s1571_s25  ;;  %p1576_p0 = scmp.lt.s32.totalorder %s2087_s14, %s2148_s8 }
 0x208   : > { %p1577_p1 = scmp.lt.s32.totalorder %s1575_s26, %s1571_s25 }
 0x209   : > { %p1573_p12 = pnand %p1572_p11, %p1734_p4 }
 0x20a   : > { %p1578_p2 = por %p1577_p1, %p1576_p0 }
 0x20b   : > { %p1574_p13 = pneg %p1573_p12 }
 0x20d   : > { %p1579_p3 = pnand %p1578_p2, %p1574_p13 }
 0x20f   : > { %1582 = shalt.err (!%p1579_p3)
}
 0x210   : > { %s2169_s23 = scalar_lea.sflag [#allocation5], %s2033_s16 }
 0x211   : > { %1344 = dma.vmem_to_hbm [thread:$0]  (%p1734_p4), %s2080_s0, 256, %s2087_s14, %s2169_s23, %s2162_s1, %s2162_s1, %s2165_s24  }
 0x212 PF: > { %p1358_p5 = scmp.ge.s32.totalorder %s1637_s10, 2  ;;  %s1036_s21 = sand.u32 1, %s1617_s27  }
 0x213   : > { %s1037_s11 = scalar_lea.sflag [#allocation3], %s1036_s21 }
 0x214   : > { %p1349_p6 = pnand %p1358_p5, %p1743_p8 }
 0x216   : > { %p1350_p7 = pneg %p1349_p6 }
 0x218   : > { %1608 = dma.done.wait (%p1350_p7), %s1037_s11, 512  }
 0x219   : > { %1610 = vsyncadd (%p1350_p7), %s1037_s11, 4294966784  ;;  %s2170_s15 = sadd.s32 4294967294, %s1637_s10  }
 0x21a   : > { %s1045_s30 = sand.u32 1, %s2170_s15  }
 0x21b   : > { %s1046_s25 = scalar_lea.sflag [#allocation5], %s1045_s30 }
 0x21c   : > { %1612 = dma.done.wait (%p1350_p7), %s1046_s25, 512  }
 0x21d   : > { %1614 = vsyncadd (%p1350_p7), %s1046_s25, 4294966784  ;;  %s25_s10 = sadd.s32 1, %s1637_s10   ;;  %s2171_s27 = smov %s1621_s28 }
 0x21e   : > { %p22_p4 = scmp.ge.s32.totalorder %s25_s10, 4   ;;  %s2172_s28 = smov %s1625_s29 }
 0x21f   : > { %s2173_s29 = smov %s1749_s18  ;;  %s2174_s30 = smov %s1633_s9 }
 0x220   : > { %s2175_s9 = smov %s2177_s13  ;;  %24 = sbr.rel (!%p22_p4) target bundleno = 9 (0x9), region = 128 }
 0x225   :  { %1060 = vsyncpa [#allocation3], 1 }
 0x226   :  { %1062 = vsyncpa [#allocation3 + $0x1], 1 }
 0x227   :  { %1063 = vsyncpa [#allocation5], 1 }
 0x228   :  { %1065 = vsyncpa [#allocation5 + $0x1], 1 }

</bundles_post_ra>
